<compile_context>
chip_gen: v5e
topology: v5e:2x2
jax: 0.10.0
libtpu: 0.0.40
codegen_flags: <defaults>
</compile_context>

<pallas_src>
import functools

import jax
import jax.numpy as jnp
from jax.experimental import pallas as pl
from jax.experimental.pallas import tpu as pltpu

_KL_WEIGHT = 0.002
_LANES = 128


def _faceloss_kernel(
    predy_ref, tgt_logit_ref, fmu_ref, fvar_ref, hmu_ref, hvar_ref,   # inputs
    out_ref,                                                          # output
    m_ref, l_ref,                                                     # scratch
    *, B, C, D, tile_b, tile_c, n_ctiles,
):
    b = pl.program_id(0)           # B-tile index (parallel / core-parallel)
    k = pl.program_id(1)           # C-tile index (reduction, "arbitrary")
    k_last = n_ctiles - 1          # static

    # ---- init per-B-tile running accumulators at the first C tile ----
    @pl.when(k == 0)
    def _():
        m_ref[...] = jnp.full_like(m_ref, -jnp.inf)
        l_ref[...] = jnp.zeros_like(l_ref)

    # ---- online logsumexp over the class axis ----
    def lse_update(logits):
        m_prev = m_ref[...]                                           # [tile_b, 1]
        m_new = jnp.maximum(m_prev, jnp.max(logits, axis=1, keepdims=True))
        alpha = jnp.exp(m_prev - m_new)
        l_ref[...] = alpha * l_ref[...] + jnp.sum(
            jnp.exp(logits - m_new), axis=1, keepdims=True)
        m_ref[...] = m_new

    if C % tile_c != 0:
        # Only the very last C tile has padded columns; keep the compare+select
        # off the hot full-tile path.  The column limit is fully static.
        n_valid_cols = C - k_last * tile_c

        @pl.when(k != k_last)
        def _():
            lse_update(predy_ref[...].astype(jnp.float32))

        @pl.when(k == k_last)
        def _():
            logits = predy_ref[...].astype(jnp.float32)
            col = jax.lax.broadcasted_iota(jnp.int32, (tile_b, tile_c), 1)
            lse_update(jnp.where(col < n_valid_cols, logits, -jnp.inf))
    else:
        lse_update(predy_ref[...].astype(jnp.float32))

    # ---- finalize: per-B-tile partial (sum of CE rows + 0.002 * sum of KL) ----
    @pl.when(k == k_last)
    def _():
        lse = m_ref[...] + jnp.log(l_ref[...])                        # [tile_b, 1]
        per_row_ce = lse - tgt_logit_ref[...]                         # [tile_b, 1]

        # KL(N(fmu, fvar) || N(hmu, hvar)) elementwise core:
        #   (fv + diff^2)/hv - log(fv/hv); "+1" and "*0.5" factored out below.
        inv_h = pl.reciprocal(hvar_ref[...], approx=False)            # [tile_b, D]
        diff = fmu_ref[...] - hmu_ref[...]
        kl_core = (fvar_ref[...] + diff * diff) * inv_h - jnp.log(fvar_ref[...] * inv_h)

        if B % tile_b != 0:
            row = jax.lax.broadcasted_iota(jnp.int32, (tile_b, 1), 0) + b * tile_b
            row_valid = row < B                                       # [tile_b, 1]
            per_row_ce = jnp.where(row_valid, per_row_ce, 0.0)
            kl_core = jnp.where(row_valid, kl_core, 0.0)
            n_valid = jnp.sum(row_valid.astype(jnp.float32), keepdims=True)  # (1, 1)
        else:
            n_valid = float(tile_b)

        ce_sum = jnp.sum(per_row_ce, keepdims=True)                   # (1, 1)
        kl_sum = 0.5 * (jnp.sum(kl_core, keepdims=True) - n_valid * float(D))
        total = ce_sum + _KL_WEIGHT * kl_sum                          # (1, 1)

        # Lane-dense output row (avoids masked narrow stores).
        out_ref[...] = jnp.broadcast_to(total, out_ref.shape).astype(out_ref.dtype)


def _round_up(x, m):
    return ((x + m - 1) // m) * m


def face_loss(predy, target, feat_mu, feat_var, HR_mu, HR_var,
              *, tile_b=None, tile_c=None, core_parallel=False):
    """Pallas implementation of FaceLoss.forward (loss_mode='ce', with KL term)."""
    B, C = predy.shape
    _, D = feat_mu.shape

    # ---- tile selection ----
    # Big B tiles (single-TC chips want few grid steps); big C tiles so the
    # double-buffered predy stream (the dominant HBM traffic) amortizes the
    # ~0.35 us per-grid-step overhead.
    if tile_b is None:
        tile_b = B if B <= 256 else 256
    if core_parallel and pl.cdiv(B, tile_b) < 2 and B > 8:
        # Ensure >= 2 B tiles so CORE_PARALLEL actually gives both v7x TCs work.
        tile_b = _round_up(-(-B // 2), 8)
    if tile_c is None:
        if C <= 8192:
            tile_c = C
        else:
            # Keep 2 * tile_b * tile_c * 4B (double-buffered predy) <= 16 MiB.
            budget_cols = (16 * 1024 * 1024) // (2 * 4 * tile_b)
            tile_c = max(512, min(8192, (budget_cols // 128) * 128))
    assert tile_b == B or tile_b % 8 == 0, "tile_b must span B or be a multiple of 8"
    assert tile_c == C or tile_c % 128 == 0, "tile_c must span C or be a multiple of 128"

    nb = pl.cdiv(B, tile_b)
    nc = pl.cdiv(C, tile_c)

    # ---- target-logit gather hoisted out of the hot loop (reads B floats) ----
    target_idx = target.reshape(B, 1).astype(jnp.int32)
    tgt_logit = jnp.take_along_axis(predy, target_idx, axis=1).astype(jnp.float32)

    # ---- explicit VMEM budget (padded to (8, 128) tiles, double-buffered) ----
    pb = _round_up(tile_b, 8)
    bytes_predy = 2 * pb * _round_up(tile_c, 128) * predy.dtype.itemsize
    bytes_kl = 2 * 4 * pb * _round_up(D, 128) * 4
    bytes_small = 2 * pb * _LANES * 4          # gathered target logits block
    bytes_out = 2 * 8 * _LANES * 4
    bytes_scratch = 2 * pb * _LANES * 4        # m / l accumulators
    vmem_required = bytes_predy + bytes_kl + bytes_small + bytes_out + bytes_scratch
    vmem_limit = min(max(vmem_required + (4 << 20), 16 << 20), 120 << 20)

    kernel = functools.partial(
        _faceloss_kernel, B=B, C=C, D=D, tile_b=tile_b, tile_c=tile_c, n_ctiles=nc)

    grid_spec = pltpu.PrefetchScalarGridSpec(
        num_scalar_prefetch=0,
        grid=(nb, nc),
        in_specs=[
            pl.BlockSpec((tile_b, tile_c), lambda b, k: (b, k)),   # predy (streamed over C)
            pl.BlockSpec((tile_b, 1), lambda b, k: (b, 0)),        # gathered target logits
            pl.BlockSpec((tile_b, D), lambda b, k: (b, 0)),        # feat_mu
            pl.BlockSpec((tile_b, D), lambda b, k: (b, 0)),        # feat_var
            pl.BlockSpec((tile_b, D), lambda b, k: (b, 0)),        # HR_mu
            pl.BlockSpec((tile_b, D), lambda b, k: (b, 0)),        # HR_var
        ],
        out_specs=pl.BlockSpec((1, 1, _LANES), lambda b, k: (b, 0, 0)),
        scratch_shapes=[
            pltpu.VMEM((tile_b, 1), jnp.float32),   # running max
            pltpu.VMEM((tile_b, 1), jnp.float32),   # running sum of exp
        ],
    )

    if core_parallel:
        dim_sem = (pltpu.CORE_PARALLEL, pltpu.ARBITRARY)
    else:
        dim_sem = ("parallel", "arbitrary")

    cost = pl.CostEstimate(
        flops=int(5 * B * C + 10 * B * D),
        transcendentals=int(B * C + 2 * B * D),
        bytes_accessed=int(predy.dtype.itemsize * B * C + 16 * B * D + 8 * B),
    )

    partials = pl.pallas_call(
        kernel,
        out_shape=jax.ShapeDtypeStruct((nb, 1, _LANES), jnp.float32),
        grid_spec=grid_spec,
        compiler_params=pltpu.CompilerParams(
            dimension_semantics=dim_sem,
            vmem_limit_bytes=int(vmem_limit),
        ),
        cost_estimate=cost,
    )(predy, tgt_logit, feat_mu, feat_var, HR_mu, HR_var)

    # Finish the batch mean outside the kernel (nb is tiny).
    return jnp.sum(partials[:, 0, 0]) / B


def _face_loss_ref(predy, target, feat_mu, feat_var, HR_mu, HR_var):
    """Pure-JAX reference mirroring the PyTorch module."""
    logp = jax.nn.log_softmax(predy.astype(jnp.float32), axis=-1)
    nll = -jnp.take_along_axis(logp, target[:, None].astype(jnp.int32), axis=1)[:, 0]
    ce = jnp.mean(nll)
    diff = feat_mu - HR_mu
    loss_mat = -(1.0 + jnp.log(feat_var / HR_var)
                 - (feat_var + diff * diff) / HR_var) / 2.0
    kl = jnp.mean(jnp.sum(loss_mat, axis=1))
    return ce + 0.002 * kl


if __name__ == "__main__":
    # Small shapes, but chosen to exercise the tiled/masked paths:
    #   B=12 with tile_b=8 -> 2 B-tiles (one ragged)
    #   C=300 with tile_c=128 -> 3 C-tiles (one ragged)
    B, C, D = 12, 300, 32
    key = jax.random.PRNGKey(0)
    k1, k2, k3, k4, k5, k6 = jax.random.split(key, 6)

    predy = jax.random.normal(k1, (B, C), dtype=jnp.float32)
    target = jax.random.randint(k2, (B,), 0, C, dtype=jnp.int32)
    feat_mu = jax.random.normal(k3, (B, D), dtype=jnp.float32)
    feat_var = jax.nn.softplus(jax.random.normal(k4, (B, D), dtype=jnp.float32)) + 0.1
    HR_mu = jax.random.normal(k5, (B, D), dtype=jnp.float32)
    HR_var = jax.nn.softplus(jax.random.normal(k6, (B, D), dtype=jnp.float32)) + 0.1

    ref = _face_loss_ref(predy, target, feat_mu, feat_var, HR_mu, HR_var)

    # Tiled configuration (multi-tile grid, ragged B and C remainders).
    loss = face_loss(predy, target, feat_mu, feat_var, HR_mu, HR_var,
                     tile_b=8, tile_c=128)
    jax.block_until_ready(loss)
    assert jnp.allclose(loss, ref, rtol=1e-4, atol=1e-5), (loss, ref)

    # Default configuration (single full-block tile at these toy sizes).
    loss2 = face_loss(predy, target, feat_mu, feat_var, HR_mu, HR_var)
    jax.block_until_ready(loss2)
    assert jnp.allclose(loss2, ref, rtol=1e-4, atol=1e-5), (loss2, ref)

    # bf16 logits path (kernel upcasts to f32 internally).
    predy_bf16 = predy.astype(jnp.bfloat16)
    ref_bf16 = _face_loss_ref(predy_bf16.astype(jnp.float32), target,
                              feat_mu, feat_var, HR_mu, HR_var)
    loss3 = face_loss(predy_bf16, target, feat_mu, feat_var, HR_mu, HR_var,
                      tile_b=8, tile_c=128)
    jax.block_until_ready(loss3)
    assert jnp.allclose(loss3, ref_bf16, rtol=1e-3, atol=1e-4), (loss3, ref_bf16)

    print("KERNEL_OK")
</pallas_src>

<mosaic_0001>
module attributes {stable_mosaic.version = 11 : i64} {
  func.func @_faceloss_kernel(%arg0: i32, %arg1: i32, %arg2: memref<8x128xf32, #tpu.memory_space<vmem>>, %arg3: memref<8x1xf32, #tpu.memory_space<vmem>>, %arg4: memref<8x32xf32, #tpu.memory_space<vmem>>, %arg5: memref<8x32xf32, #tpu.memory_space<vmem>>, %arg6: memref<8x32xf32, #tpu.memory_space<vmem>>, %arg7: memref<8x32xf32, #tpu.memory_space<vmem>>, %arg8: memref<1x1x128xf32, #tpu.memory_space<vmem>>, %arg9: memref<8x1xf32, #tpu.memory_space<vmem>>, %arg10: memref<8x1xf32, #tpu.memory_space<vmem>>) attributes {dimension_semantics = [#tpu.dimension_semantics<parallel>, #tpu.dimension_semantics<arbitrary>], iteration_bounds = array<i64: 2, 3>, scalar_prefetch = 0 : i64, scratch_operands = 2 : i64, tpu.core_type = #tpu.core_type<tc>, window_params = [{transform_indices = @transform_0, window_bounds = array<i64: 8, 128>}, {transform_indices = @transform_1, window_bounds = array<i64: 8, 1>}, {transform_indices = @transform_2, window_bounds = array<i64: 8, 32>}, {transform_indices = @transform_3, window_bounds = array<i64: 8, 32>}, {transform_indices = @transform_4, window_bounds = array<i64: 8, 32>}, {transform_indices = @transform_5, window_bounds = array<i64: 8, 32>}, {transform_indices = @transform_6, window_bounds = array<i64: 1, 1, 128>}]} {
    %c0_i32 = arith.constant 0 : i32
    %0 = arith.cmpi eq, %arg1, %c0_i32 : i32
    %1 = arith.extui %0 : i1 to i32
    %c0_i32_0 = arith.constant 0 : i32
    %2 = arith.cmpi ne, %1, %c0_i32_0 : i32
    scf.if %2 {
      %cst = arith.constant 0xFF800000 : f32
      %12 = vector.broadcast %cst : f32 to vector<8x1xf32>
      %c0 = arith.constant 0 : index
      %c0_6 = arith.constant 0 : index
      %13 = vector.load %arg9[%c0, %c0_6] : memref<8x1xf32, #tpu.memory_space<vmem>>, vector<8x1xf32>
      tpu.vector_store %arg9[%c0, %c0_6], %12 {strides = array<i32>} : memref<8x1xf32, #tpu.memory_space<vmem>>, vector<8x1xf32>,
      %cst_7 = arith.constant 0.000000e+00 : f32
      %14 = vector.broadcast %cst_7 : f32 to vector<8x1xf32>
      %c0_8 = arith.constant 0 : index
      %c0_9 = arith.constant 0 : index
      %15 = vector.load %arg10[%c0_8, %c0_9] : memref<8x1xf32, #tpu.memory_space<vmem>>, vector<8x1xf32>
      tpu.vector_store %arg10[%c0_8, %c0_9], %14 {strides = array<i32>} : memref<8x1xf32, #tpu.memory_space<vmem>>, vector<8x1xf32>,
    } else {
    }
    %c2_i32 = arith.constant 2 : i32
    %3 = arith.cmpi ne, %arg1, %c2_i32 : i32
    %4 = arith.extui %3 : i1 to i32
    %c0_i32_1 = arith.constant 0 : i32
    %5 = arith.cmpi ne, %4, %c0_i32_1 : i32
    scf.if %5 {
      %c0 = arith.constant 0 : index
      %c0_6 = arith.constant 0 : index
      %12 = vector.load %arg2[%c0, %c0_6] : memref<8x128xf32, #tpu.memory_space<vmem>>, vector<8x128xf32>
      %c0_7 = arith.constant 0 : index
      %c0_8 = arith.constant 0 : index
      %13 = vector.load %arg9[%c0_7, %c0_8] : memref<8x1xf32, #tpu.memory_space<vmem>>, vector<8x1xf32>
      %cst = arith.constant dense<0xFF800000> : vector<8xf32>
      %14 = vector.multi_reduction <maximumf>, %12, %cst [1] : vector<8x128xf32> to vector<8xf32>
      %15 = vector.shape_cast %14 : vector<8xf32> to vector<8x1xf32>
      %16 = arith.maximumf %13, %15 : vector<8x1xf32>
      %17 = arith.subf %13, %16 : vector<8x1xf32>
      %18 = math.exp %17 : vector<8x1xf32>
      %c0_9 = arith.constant 0 : index
      %c0_10 = arith.constant 0 : index
      %19 = vector.load %arg10[%c0_9, %c0_10] : memref<8x1xf32, #tpu.memory_space<vmem>>, vector<8x1xf32>
      %20 = arith.mulf %18, %19 : vector<8x1xf32>
      %21 = vector.broadcast %16 : vector<8x1xf32> to vector<8x128xf32>
      %22 = arith.subf %12, %21 : vector<8x128xf32>
      %23 = math.exp %22 : vector<8x128xf32>
      %cst_11 = arith.constant dense<0.000000e+00> : vector<8xf32>
      %24 = vector.multi_reduction <add>, %23, %cst_11 [1] : vector<8x128xf32> to vector<8xf32>
      %25 = vector.shape_cast %24 : vector<8xf32> to vector<8x1xf32>
      %26 = arith.addf %20, %25 : vector<8x1xf32>
      %c0_12 = arith.constant 0 : index
      %c0_13 = arith.constant 0 : index
      %27 = vector.load %arg10[%c0_12, %c0_13] : memref<8x1xf32, #tpu.memory_space<vmem>>, vector<8x1xf32>
      tpu.vector_store %arg10[%c0_12, %c0_13], %26 {strides = array<i32>} : memref<8x1xf32, #tpu.memory_space<vmem>>, vector<8x1xf32>,
      %c0_14 = arith.constant 0 : index
      %c0_15 = arith.constant 0 : index
      %28 = vector.load %arg9[%c0_14, %c0_15] : memref<8x1xf32, #tpu.memory_space<vmem>>, vector<8x1xf32>
      tpu.vector_store %arg9[%c0_14, %c0_15], %16 {strides = array<i32>} : memref<8x1xf32, #tpu.memory_space<vmem>>, vector<8x1xf32>,
    } else {
    }
    %c2_i32_2 = arith.constant 2 : i32
    %6 = arith.cmpi eq, %arg1, %c2_i32_2 : i32
    %7 = arith.extui %6 : i1 to i32
    %c0_i32_3 = arith.constant 0 : i32
    %8 = arith.cmpi ne, %7, %c0_i32_3 : i32
    scf.if %8 {
      %c0 = arith.constant 0 : index
      %c0_6 = arith.constant 0 : index
      %12 = vector.load %arg2[%c0, %c0_6] : memref<8x128xf32, #tpu.memory_space<vmem>>, vector<8x128xf32>
      %13 = tpu.iota {dimensions = array<i32: 1>} : vector<8x128xi32>
      %c44_i32 = arith.constant 44 : i32
      %14 = vector.broadcast %c44_i32 : i32 to vector<8x128xi32>
      %15 = arith.cmpi slt, %13, %14 : vector<8x128xi32>
      %cst = arith.constant 0xFF800000 : f32
      %16 = vector.broadcast %cst : f32 to vector<8x128xf32>
      %17 = arith.select %15, %12, %16 : vector<8x128xi1>, vector<8x128xf32>
      %c0_7 = arith.constant 0 : index
      %c0_8 = arith.constant 0 : index
      %18 = vector.load %arg9[%c0_7, %c0_8] : memref<8x1xf32, #tpu.memory_space<vmem>>, vector<8x1xf32>
      %cst_9 = arith.constant dense<0xFF800000> : vector<8xf32>
      %19 = vector.multi_reduction <maximumf>, %17, %cst_9 [1] : vector<8x128xf32> to vector<8xf32>
      %20 = vector.shape_cast %19 : vector<8xf32> to vector<8x1xf32>
      %21 = arith.maximumf %18, %20 : vector<8x1xf32>
      %22 = arith.subf %18, %21 : vector<8x1xf32>
      %23 = math.exp %22 : vector<8x1xf32>
      %c0_10 = arith.constant 0 : index
      %c0_11 = arith.constant 0 : index
      %24 = vector.load %arg10[%c0_10, %c0_11] : memref<8x1xf32, #tpu.memory_space<vmem>>, vector<8x1xf32>
      %25 = arith.mulf %23, %24 : vector<8x1xf32>
      %26 = vector.broadcast %21 : vector<8x1xf32> to vector<8x128xf32>
      %27 = arith.subf %17, %26 : vector<8x128xf32>
      %28 = math.exp %27 : vector<8x128xf32>
      %cst_12 = arith.constant dense<0.000000e+00> : vector<8xf32>
      %29 = vector.multi_reduction <add>, %28, %cst_12 [1] : vector<8x128xf32> to vector<8xf32>
      %30 = vector.shape_cast %29 : vector<8xf32> to vector<8x1xf32>
      %31 = arith.addf %25, %30 : vector<8x1xf32>
      %c0_13 = arith.constant 0 : index
      %c0_14 = arith.constant 0 : index
      %32 = vector.load %arg10[%c0_13, %c0_14] : memref<8x1xf32, #tpu.memory_space<vmem>>, vector<8x1xf32>
      tpu.vector_store %arg10[%c0_13, %c0_14], %31 {strides = array<i32>} : memref<8x1xf32, #tpu.memory_space<vmem>>, vector<8x1xf32>,
      %c0_15 = arith.constant 0 : index
      %c0_16 = arith.constant 0 : index
      %33 = vector.load %arg9[%c0_15, %c0_16] : memref<8x1xf32, #tpu.memory_space<vmem>>, vector<8x1xf32>
      tpu.vector_store %arg9[%c0_15, %c0_16], %21 {strides = array<i32>} : memref<8x1xf32, #tpu.memory_space<vmem>>, vector<8x1xf32>,
    } else {
    }
    %c2_i32_4 = arith.constant 2 : i32
    %9 = arith.cmpi eq, %arg1, %c2_i32_4 : i32
    %10 = arith.extui %9 : i1 to i32
    %c0_i32_5 = arith.constant 0 : i32
    %11 = arith.cmpi ne, %10, %c0_i32_5 : i32
    scf.if %11 {
      %c0 = arith.constant 0 : index
      %c0_6 = arith.constant 0 : index
      %12 = vector.load %arg9[%c0, %c0_6] : memref<8x1xf32, #tpu.memory_space<vmem>>, vector<8x1xf32>
      %c0_7 = arith.constant 0 : index
      %c0_8 = arith.constant 0 : index
      %13 = vector.load %arg10[%c0_7, %c0_8] : memref<8x1xf32, #tpu.memory_space<vmem>>, vector<8x1xf32>
      %14 = math.log %13 : vector<8x1xf32>
      %15 = arith.addf %12, %14 : vector<8x1xf32>
      %c0_9 = arith.constant 0 : index
      %c0_10 = arith.constant 0 : index
      %16 = vector.load %arg3[%c0_9, %c0_10] : memref<8x1xf32, #tpu.memory_space<vmem>>, vector<8x1xf32>
      %17 = arith.subf %15, %16 : vector<8x1xf32>
      %c0_11 = arith.constant 0 : index
      %c0_12 = arith.constant 0 : index
      %18 = vector.load %arg7[%c0_11, %c0_12] : memref<8x32xf32, #tpu.memory_space<vmem>>, vector<8x32xf32>
      %19 = tpu.reciprocal %18 : vector<8x32xf32> -> vector<8x32xf32>
      %c0_13 = arith.constant 0 : index
      %c0_14 = arith.constant 0 : index
      %20 = vector.load %arg4[%c0_13, %c0_14] : memref<8x32xf32, #tpu.memory_space<vmem>>, vector<8x32xf32>
      %c0_15 = arith.constant 0 : index
      %c0_16 = arith.constant 0 : index
      %21 = vector.load %arg6[%c0_15, %c0_16] : memref<8x32xf32, #tpu.memory_space<vmem>>, vector<8x32xf32>
      %22 = arith.subf %20, %21 : vector<8x32xf32>
      %c0_17 = arith.constant 0 : index
      %c0_18 = arith.constant 0 : index
      %23 = vector.load %arg5[%c0_17, %c0_18] : memref<8x32xf32, #tpu.memory_space<vmem>>, vector<8x32xf32>
      %24 = arith.mulf %22, %22 : vector<8x32xf32>
      %25 = arith.addf %23, %24 : vector<8x32xf32>
      %26 = arith.mulf %25, %19 : vector<8x32xf32>
      %c0_19 = arith.constant 0 : index
      %c0_20 = arith.constant 0 : index
      %27 = vector.load %arg5[%c0_19, %c0_20] : memref<8x32xf32, #tpu.memory_space<vmem>>, vector<8x32xf32>
      %28 = arith.mulf %27, %19 : vector<8x32xf32>
      %29 = math.log %28 : vector<8x32xf32>
      %30 = arith.subf %26, %29 : vector<8x32xf32>
      %31 = tpu.iota {dimensions = array<i32: 0>} : vector<8x1xi32>
      %c8_i32 = arith.constant 8 : i32
      %32 = arith.muli %arg0, %c8_i32 : i32
      %33 = vector.broadcast %32 : i32 to vector<8x1xi32>
      %34 = arith.addi %31, %33 : vector<8x1xi32>
      %c12_i32 = arith.constant 12 : i32
      %35 = vector.broadcast %c12_i32 : i32 to vector<8x1xi32>
      %36 = arith.cmpi slt, %34, %35 : vector<8x1xi32>
      %cst = arith.constant 0.000000e+00 : f32
      %37 = vector.broadcast %cst : f32 to vector<8x1xf32>
      %38 = arith.select %36, %17, %37 : vector<8x1xi1>, vector<8x1xf32>
      %cst_21 = arith.constant 0.000000e+00 : f32
      %39 = vector.shape_cast %36 : vector<8x1xi1> to vector<8x1xi1>
      %40 = vector.broadcast %39 : vector<8x1xi1> to vector<8x32xi1>
      %41 = vector.broadcast %cst_21 : f32 to vector<8x32xf32>
      %42 = arith.select %40, %30, %41 : vector<8x32xi1>, vector<8x32xf32>
      %43 = arith.extui %36 : vector<8x1xi1> to vector<8x1xi32>
      %44 = arith.sitofp %43 : vector<8x1xi32> to vector<8x1xf32>
      %45 = vector.shape_cast %44 : vector<8x1xf32> to vector<1x8x1xf32>
      %cst_22 = arith.constant dense<0.000000e+00> : vector<1xf32>
      %46 = vector.multi_reduction <add>, %45, %cst_22 [1, 2] : vector<1x8x1xf32> to vector<1xf32>
      %47 = vector.shape_cast %46 : vector<1xf32> to vector<1x1x1xf32>
      %48 = vector.extract %47[0, 0, 0] : f32 from vector<1x1x1xf32>
      %49 = vector.broadcast %48 : f32 to vector<1x1xf32>
      %50 = vector.shape_cast %38 : vector<8x1xf32> to vector<1x8x1xf32>
      %cst_23 = arith.constant dense<0.000000e+00> : vector<1xf32>
      %51 = vector.multi_reduction <add>, %50, %cst_23 [1, 2] : vector<1x8x1xf32> to vector<1xf32>
      %52 = vector.shape_cast %51 : vector<1xf32> to vector<1x1x1xf32>
      %53 = vector.extract %52[0, 0, 0] : f32 from vector<1x1x1xf32>
      %54 = vector.broadcast %53 : f32 to vector<1x1xf32>
      %55 = vector.shape_cast %42 : vector<8x32xf32> to vector<1x8x32xf32>
      %cst_24 = arith.constant dense<0.000000e+00> : vector<1xf32>
      %56 = vector.multi_reduction <add>, %55, %cst_24 [1, 2] : vector<1x8x32xf32> to vector<1xf32>
      %57 = vector.shape_cast %56 : vector<1xf32> to vector<1x1x1xf32>
      %58 = vector.extract %57[0, 0, 0] : f32 from vector<1x1x1xf32>
      %59 = vector.broadcast %58 : f32 to vector<1x1xf32>
      %cst_25 = arith.constant 3.200000e+01 : f32
      %60 = vector.broadcast %cst_25 : f32 to vector<1x1xf32>
      %61 = arith.mulf %49, %60 : vector<1x1xf32>
      %62 = arith.subf %59, %61 : vector<1x1xf32>
      %cst_26 = arith.constant 5.000000e-01 : f32
      %63 = vector.broadcast %cst_26 : f32 to vector<1x1xf32>
      %64 = arith.mulf %63, %62 : vector<1x1xf32>
      %cst_27 = arith.constant 2.000000e-03 : f32
      %65 = vector.broadcast %cst_27 : f32 to vector<1x1xf32>
      %66 = arith.mulf %65, %64 : vector<1x1xf32>
      %67 = arith.addf %54, %66 : vector<1x1xf32>
      %68 = vector.shape_cast %67 : vector<1x1xf32> to vector<1x1x1xf32>
      %69 = vector.broadcast %68 : vector<1x1x1xf32> to vector<1x1x128xf32>
      %c0_28 = arith.constant 0 : index
      %c0_29 = arith.constant 0 : index
      %c0_30 = arith.constant 0 : index
      %70 = vector.load %arg8[%c0_28, %c0_29, %c0_30] : memref<1x1x128xf32, #tpu.memory_space<vmem>>, vector<1x1x128xf32>
      tpu.vector_store %arg8[%c0_28, %c0_29, %c0_30], %69 {strides = array<i32>} : memref<1x1x128xf32, #tpu.memory_space<vmem>>, vector<1x1x128xf32>,
    } else {
    }
    return
  }
  func.func @transform_0(%arg0: i32, %arg1: i32) -> (i32, i32) {
    %c0_i32 = arith.constant 0 : i32
    return %arg0, %arg1 : i32, i32
  }
  func.func @transform_1(%arg0: i32, %arg1: i32) -> (i32, i32) {
    %c0_i32 = arith.constant 0 : i32
    %c0_i32_0 = arith.constant 0 : i32
    return %arg0, %c0_i32 : i32, i32
  }
  func.func @transform_2(%arg0: i32, %arg1: i32) -> (i32, i32) {
    %c0_i32 = arith.constant 0 : i32
    %c0_i32_0 = arith.constant 0 : i32
    return %arg0, %c0_i32 : i32, i32
  }
  func.func @transform_3(%arg0: i32, %arg1: i32) -> (i32, i32) {
    %c0_i32 = arith.constant 0 : i32
    %c0_i32_0 = arith.constant 0 : i32
    return %arg0, %c0_i32 : i32, i32
  }
  func.func @transform_4(%arg0: i32, %arg1: i32) -> (i32, i32) {
    %c0_i32 = arith.constant 0 : i32
    %c0_i32_0 = arith.constant 0 : i32
    return %arg0, %c0_i32 : i32, i32
  }
  func.func @transform_5(%arg0: i32, %arg1: i32) -> (i32, i32) {
    %c0_i32 = arith.constant 0 : i32
    %c0_i32_0 = arith.constant 0 : i32
    return %arg0, %c0_i32 : i32, i32
  }
  func.func @transform_6(%arg0: i32, %arg1: i32) -> (i32, i32, i32) {
    %c0_i32 = arith.constant 0 : i32
    %c0_i32_0 = arith.constant 0 : i32
    %c0_i32_1 = arith.constant 0 : i32
    return %arg0, %c0_i32, %c0_i32_0 : i32, i32, i32
  }
}

</mosaic_0001>

<bundles_post_ra>
// kernel: tpu_custom_call.1
= control target key start
LH: loop header
LB: loop body
LE: loop exit
PB: predicated region body
PF: predicated region fallthrough
CT: control target
= control target key end

     0   :  { %s1535_s0 = inlined_call_operand.hbm [shape: f32[12,300], index: 0, kind: input, shape index: {}]   ;;  %s1536_s1 = inlined_call_operand.vmem [shape: f32[12,1], index: 1, kind: input, shape index: {}]   ;;  %s1537_s2 = inlined_call_operand.vmem [shape: f32[12,32], index: 2, kind: input, shape index: {}]   ;;  %s1538_s3 = inlined_call_operand.hbm [shape: f32[12,32], index: 3, kind: input, shape index: {}]   ;;  %s1539_s4 = inlined_call_operand.hbm [shape: f32[12,32], index: 4, kind: input, shape index: {}]   ;;  %s1540_s5 = inlined_call_operand.hbm [shape: f32[12,32], index: 5, kind: input, shape index: {}]   ;;  %s1541_s6 = inlined_call_operand.hbm [shape: f32[2,1,128], index: 6, kind: output, shape index: {}]  }
   0x1   :  { %1556 = sst [smem:[#allocation28_spill]] %s1536_s1 }
   0x2   :  { %1557 = sst [smem:[#allocation29_spill]] %s1537_s2 }
   0x3   :  { %1558 = sst [smem:[#allocation30_spill]] %s1538_s3 }
   0x4   :  { %1559 = sst [smem:[#allocation31_spill]] %s1541_s6 }
   0x5   :  { %11 = vsyncpa [#allocation5], 0 }
   0x6   :  { %13 = vsyncpa [#allocation5 + $0x1], 0 }
   0x7   :  { %14 = vsyncpa [#allocation8], 0 }
   0x8   :  { %16 = vsyncpa [#allocation8 + $0x1], 0 }
   0x9   :  { %17 = vsyncpa [#allocation11], 0 }
   0xa   :  { %19 = vsyncpa [#allocation11 + $0x1], 0 }
   0xb   :  { %20 = vsyncpa [#allocation6], 0 }
   0xc   :  { %22 = vsyncpa [#allocation6 + $0x1], 0  ;;  %s1228_s21 = smov 0   ;;  %s1230_s22 = smov 0  }
   0xd   :  { %s1232_s23 = smov 0   ;;  %s1234_s24 = smov 0  }
   0xe   :  { %s1236_s25 = smov 0   ;;  %s1238_s26 = smov 0  }
   0xf   :  { %s1240_s27 = smov 0   ;;  %s1242_s28 = smov 0  }
  0x10   :  { %s1244_s29 = smov 0   ;;  %s1246_s30 = smov 0  }
  0x11   :  { %s1248_s7 = smov 0  }
  0x12 LB: > { %1560 = sst [smem:[#allocation17_spill]] %s1146_s21  ;;  %s1284_s8 = sadd.s32 4294967295, %s1186_s7   ;;  %s1186_s7 = sphi %s1248_s7, %s28_s7   ;;  %s1182_s30 = sphi %s1246_s30, %s1600_s30   ;;  %s1178_s29 = sphi %s1244_s29, %s1607_s29   ;;  %s1174_s28 = sphi %s1242_s28, %s1598_s28   ;;  %s1170_s27 = sphi %s1240_s27, %s1606_s27   ;;  %s1166_s26 = sphi %s1238_s26, %s1605_s26   ;;  %s1162_s25 = sphi %s1236_s25, %s1604_s25   ;;  %s1158_s24 = sphi %s1234_s24, %s1603_s24   ;;  %s1154_s23 = sphi %s1232_s23, %s1602_s23   ;;  %s1150_s22 = sphi %s1230_s22, %s1601_s22   ;;  %s1146_s21 = sphi %s1228_s21, %s1597_s21  }
  0x13   : > { %1561 = sst [smem:[#allocation18_spill]] %s1150_s22  ;;  %s766_s9 = sadd.s32 4294967294, %s1186_s7  }
  0x14   : > { %1562 = sst [smem:[#allocation19_spill]] %s1170_s27  ;;  %p57_p0 = scmp.eq.s32.totalorder %s1186_s7, 0 }
  0x15   : > { %1563 = sst [smem:[#allocation20_spill]] %s1174_s28  ;;  %p63_p1 = scmp.eq.s32.totalorder %s1284_s8, 0 }
  0x16   : > { %1564 = sst [smem:[#allocation21_spill]] %s1182_s30  ;;  %p134_p2 = scmp.ne.s32.totalorder %s1154_s23, %s1150_s22 }
  0x17   : > { %1565 = sst [smem:[#allocation22_spill]] %s1284_s8  ;;  %p140_p3 = scmp.ne.s32.totalorder %s1150_s22, %s1146_s21 }
  0x18   : > { %p216_p4 = scmp.eq.s32.totalorder %s1284_s8, 5  ;;  %p1297_p5 = por %p134_p2, %p57_p0 }
  0x19   : > { %p222_p6 = scmp.eq.s32.totalorder %s766_s9, 5  ;;  %p1303_p7 = por %p140_p3, %p63_p1 }
  0x1a   : > { %p1307_p8 = por %p216_p4, %p134_p2  ;;  %p825_p10 = scmp.lt.s32.totalorder %s1186_s7, 6 }
  0x1b   : > { %s1567_s12 = scalar_select %p1303_p7, 1, 0 }
  0x1c   : > { %s1569_s13 = scalar_select %p1307_p8, 1, 0 }
  0x1d   : > { %1568 = sst [smem:[#allocation23_spill]] %s1567_s12  ;;  %p1311_p9 = por %p222_p6, %p140_p3 }
  0x1e   : > { %1570 = sst [smem:[#allocation24_spill]] %s1569_s13  ;;  %s277_s15 = sand.u32 1, %s1186_s7  }
  0x1f   : > { %s1571_s14 = scalar_select %p1311_p9, 1, 0 }
  0x20   : > { %s1544_s16 = sand.u32 1, %s1154_s23   ;;  %s1323_s18 = sshll.u32 %s1182_s30, 3 }
  0x21   : > { %1572 = sst [smem:[#allocation25_spill]] %s1571_s14  ;;  %s1320_s17 = sshll.u32 %s1544_s16, 3 }
  0x22   : > { %s1573_s3 = sld [smem:[#allocation30_spill]]  ;;  %s281_s14 = scalar_lea.vmem [#allocation7], %s1320_s17 }
  0x23   : > { %s289_s21 = sshll.u32 %s281_s14, 4  ;;  %p1334_p11 = pnand %p825_p10, %p1297_p5  ;;  %s290_s21 = int_to_ptr.vmem [resolvable:$true] %s289_s21 }
  0x24   : > { %p777_p12 = scmp.ge.s32.totalorder %s1186_s7, 1  ;;  %p332_p13 = scmp.lt.s32.totalorder %s1186_s7, 7 }
  0x25   : > { %s1340_s19 = scalar_lea.sflag [#allocation8], %s277_s15  ;;  %s37_s14 = sadd.s32 1, %s1178_s29 }
  0x26   : > { %p1345_p2 = pnand %p777_p12, %p332_p13  ;;  %p38_p3 = scmp.ge.s32.totalorder %s37_s14, 3 }
  0x27   : > { %s40_s20 = sadd.s32 1, %s1182_s30  ;;  %p56_p4 = scmp.ne.s32.totalorder %s1166_s26, %s1162_s25 }
  0x28   : > { %s285_s9 = scalar_lea.hbm %s1573_s3, %s1323_s18  ;;  %s1609_s14 = smov (%p38_p3, %s37_s14), 0 }
  0x29   : > { %s287_s10 = sshll.u32 %s285_s9, 4  ;;  %s49_s9 = sadd.s32 1, %s1166_s26  ;;  %s288_s10 = int_to_ptr.hbm [resolvable:$true] %s287_s10 }
  0x2a   : > { %814 = dma.hbm_to_vmem [thread:$0]  (!%p1334_p11), %s288_s10, 128, %s290_s21, %s1340_s19  }
  0x2b   : > { %1576 = sst [smem:[#allocation26_spill]] %s1609_s14  ;;  %s1611_s20 = smov (!%p38_p3, %s40_s20), %s1182_s30 }
  0x2c   : > { %s45_s21 = ssub.s32 %s1178_s29, %s1609_s14  ;;  %p1361_p5 = por %p57_p0, %p56_p4 }
  0x2d   : > { %p42_p6 = scmp.ge.s32.totalorder %s1611_s20, 2  ;;  %p62_p12 = scmp.ne.s32.totalorder %s1162_s25, %s1158_s24 }
  0x2e   : > { %s242_s15 = sand.u32 1, %s1166_s26   ;;  %s791_s3 = smul.u32 3, %s1182_s30 }
  0x2f   : > { %s1613_s20 = smov (%p42_p6, %s1611_s20), 0  ;;  %p1373_p13 = por %p63_p1, %p62_p12 }
  0x30   : > { %1578 = sst [smem:[#allocation27_spill]] %s1613_s20  ;;  %s44_s14 = ssub.s32 %s1182_s30, %s1613_s20 }
  0x31   : > { %s769_s6 = sshll.u32 %s242_s15, 3  ;;  %s46_s27 = sor.u32 %s45_s21, %s44_s14 }
  0x32   : > { %p125_p0 = scmp.eq.s32.totalorder %s44_s14, 0  ;;  %p47_p3 = scmp.eq.s32.totalorder %s46_s27, 0 }
  0x33   : > { %s1580_s24 = sadd.s32 1, %s1154_s23  ;;  %s250_s28 = sadd.s32 %s1178_s29, %s791_s3 }
  0x34   : > { %s1382_s2 = scalar_select %p125_p0, %s1154_s23, %s1580_s24  }
  0x35   : > { %s1385_s1 = scalar_select %p47_p3, %s1166_s26, %s49_s9  }
  0x36   : > { %s246_s12 = scalar_lea.vmem [#allocation4], %s769_s6  ;;  %s770_s8 = sshll.u32 %s250_s28, 3 }
  0x37   : > { %s256_s22 = sshll.u32 %s246_s12, 4  ;;  %s252_s14 = scalar_lea.hbm %s1535_s0, %s770_s8  ;;  %s257_s22 = int_to_ptr.vmem [resolvable:$true] %s256_s22 }
  0x38   : > { %p809_p1 = pnand %p825_p10, %p1361_p5  ;;  %s254_s27 = sshll.u32 %s252_s14, 4  ;;  %s255_s27 = int_to_ptr.hbm [resolvable:$true] %s254_s27 }
  0x39   : > { %s243_s9 = scalar_lea.sflag [#allocation5], %s242_s15  ;;  %s304_s12 = scalar_lea.hbm %s1539_s4, %s1323_s18 }
  0x3a   : > { %811 = dma.hbm_to_vmem [thread:$0]  (!%p809_p1), %s255_s27, 128, %s257_s22, %s243_s9  }
  0x3b   : > { %s300_s28 = scalar_lea.vmem [#allocation9], %s1320_s17  ;;  %s306_s24 = sshll.u32 %s304_s12, 4  ;;  %s307_s24 = int_to_ptr.hbm [resolvable:$true] %s306_s24 }
  0x3c   : > { %s308_s21 = sshll.u32 %s300_s28, 4  ;;  %s323_s20 = scalar_lea.hbm %s1540_s5, %s1323_s18  ;;  %s309_s21 = int_to_ptr.vmem [resolvable:$true] %s308_s21 }
  0x3d   : > { %817 = dma.hbm_to_vmem [thread:$0]  (!%p1334_p11), %s307_s24, 128, %s309_s21, %s1340_s19  }
  0x3e   : > { %s325_s10 = sshll.u32 %s323_s20, 4  ;;  %s319_s14 = scalar_lea.vmem [#allocation10], %s1320_s17  ;;  %s326_s10 = int_to_ptr.hbm [resolvable:$true] %s325_s10 }
  0x3f   : > { %s327_s15 = sshll.u32 %s319_s14, 4  ;;  %s1581_s22 = sand.u32 1, %s1154_s23   ;;  %s328_s15 = int_to_ptr.vmem [resolvable:$true] %s327_s15 }
  0x40   : > { %s316_s27 = scalar_lea.sflag [#allocation11], %s1581_s22  ;;  %336 = sbr.rel (%p1345_p2) target bundleno = 1101 (0x44d), region = 44 }
  0x41   : > { %820 = dma.hbm_to_vmem [thread:$0]  (!%p1334_p11), %s326_s10, 128, %s328_s15, %s316_s27  }
  0x42   : > { %s338_s9 = sand.u32 (!%p1345_p2), 1, %s1162_s25  }
  0x43   : > { %s1415_s19 = sshll.u32 (!%p1345_p2), %s338_s9, 3  ;;  %s339_s3 = scalar_lea.sflag (!%p1345_p2), [#allocation5], %s338_s9 }
  0x44   : > { %s342_s18 = scalar_lea.vmem (!%p1345_p2), [#allocation4], %s1415_s19 }
  0x45   : > { %1129 = dma.done.wait (%p1373_p13), %s339_s3, 128  }
  0x46   : > { %1131 = vsyncadd (%p1373_p13), %s339_s3, 4294967168  ;;  %s1582_s17 = sld [smem:[#allocation22_spill]] }
  0x47   : > { %s1583_s6 = sld [smem:[#allocation18_spill]] }
  0x4c   : > { %s348_s12 = sand.u32 1, %s1582_s17  }
  0x4d   : > { %s1424_s28 = sand.u32 1, %s1583_s6   ;;  %s349_s21 = scalar_lea.sflag [#allocation8], %s348_s12 }
  0x4e   : > { %s1427_s11 = sshll.u32 %s1424_s28, 3 }
  0x4f   : > { %s352_s24 = scalar_lea.vmem [#allocation7], %s1427_s11 }
  0x50   : > { %1133 = dma.done.wait (%p1303_p7), %s349_s21, 256  }
  0x51   : > { %1135 = vsyncadd (%p1303_p7), %s349_s21, 4294967040  ;;  %s362_s13 = scalar_lea.vmem [#allocation9], %s1427_s11  ;;  %s369_s30 = scalar_lea.sflag [#allocation11], %s1424_s28 }
  0x52   : > { %s372_s8 = scalar_lea.vmem [#allocation10], %s1427_s11 }
  0x53   : > { %1137 = dma.done.wait (%p1303_p7), %s369_s30, 128  }
  0x54   : > { %1139 = vsyncadd (%p1303_p7), %s369_s30, 4294967168  ;;  %s1585_s20 = sld [smem:[#allocation20_spill]]  ;;  %s423_s12 = scalar_lea.vmem [#allocation12], %s1424_s28 }
  0x55   : > { %s1586_s22 = sld [smem:[#allocation28_spill]] }
  0x56   : > { %s1587_s17 = sld [smem:[#allocation29_spill]] }
  0x57   : > { %s1588_s21 = sld [smem:[#allocation19_spill]] }
  0x5a   : > { %p424_p10 = scmp.lt.s32.totalorder %s1585_s20, 1 }
  0x5c   : > { %s1615_s20 = smov (!%p424_p10, %s1585_s20), 1 }
  0x5d   : > { %s782_s10 = sshll.u32 %s1615_s20, 3  ;;  %p784_p11 = scmp.ne.s32.totalorder %s1588_s21, 0 }
  0x5e   : > { %s1446_s27 = scalar_lea.vmem %s1586_s22, %s782_s10  ;;  %s1451_s6 = scalar_lea.vmem %s1587_s17, %s782_s10 }
  0x5f   : > { %435 = sbr.rel (%p784_p11) target bundleno = 103 (0x67), region = 64 }
  0x64   : > { %vm436_vm0 = vcmask 7168   ;;  %v1188_v0 = vmov -inf   ;;  %v1189_v1 = vmov 0.0  }
  0x65   : > { %437 = vst.msk [vmem:[#allocation2] sm:$0xff] %vm436_vm0, %v1188_v0 }
  0x66   : > { %438 = vst.msk [vmem:[#allocation3] sm:$0xff] %vm436_vm0, %v1189_v1 }
  0x67 PF: > { %s1589_s16 = sld [smem:[#allocation19_spill]] }
  0x6d   : > { %p785_p7 = scmp.eq.s32.totalorder %s1589_s16, 2 }
  0x6f   : > { %442 = sbr.rel (%p785_p7) target bundleno = 480 (0x1e0), region = 68 }
  0x74   : > { %v443_v2 = vld [vmem:[%s342_s18] sm:$0xff]  ;;  %v1190_v3 = vmov 0   ;;  %v444_v4 = vld [vmem:[#allocation2] sm:$0xff]  ;;  %vm464_vm1 = vcmask 7168   ;;  %v451_v14 = vld [vmem:[#allocation3] sm:$0xff] }
  0x75   : > { %445 = vmax.xlane.f32.xlu0 %v443_v2 }
  0x76   : > { %920 = vset.pattern.permute.xlu0 %v1190_v3 }
  0xe8   : > { %v446_v5 = vpop.xlane.xlu0 %445 }
  0xe9   : > { %v447_v6 = vmax.f32 %v444_v4, %v446_v5 }
  0xeb   : > { %v448_v7 = vsub.f32 %v444_v4, %v447_v6  ;;  %466 = vst.msk [vmem:[#allocation2] sm:$0xff] %vm464_vm1, %v447_v6  ;;  %455 = vperm.xlu0 %920, %v447_v6  }
  0xed   : > { %v449_v12 = vmul.f32 1.442695, %v448_v7 }
 0x15d   : > { %v456_v8 = vpop.permute.xlu0 %455 }
 0x15e   : > { %v458_v9 = vsub.f32 %v443_v2, %v456_v8 }
 0x160   : > { %v459_v10 = vmul.f32 1.442695, %v458_v9 }
 0x162   : > { %921 = vpow2.f32 %v459_v10 }
 0x163   : > { %923 = vpow2.f32 %v449_v12 }
 0x168   : > { %v922_v11 = vpop.eup %921 }
 0x169   : > { %461 = vadd.xlane.f32.xlu1 %v922_v11  ;;  %v924_v13 = vpop.eup %923 }
 0x16a   : > { %v452_v15 = vmul.f32 %v924_v13, %v451_v14 }
 0x1dc   : > { %v462_v16 = vpop.xlane.xlu1 %461 }
 0x1dd   : > { %v463_v17 = vadd.f32 %v462_v16, %v452_v15 }
 0x1df   : > { %465 = vst.msk [vmem:[#allocation3] sm:$0xff] %vm464_vm1, %v463_v17 }
 0x1e0 PF: > { %s1590_s30 = sld [smem:[#allocation19_spill]] }
 0x1e6   : > { %p786_p2 = scmp.ne.s32.totalorder %s1590_s30, 2 }
 0x1e7   : > { %s1591_s20 = sld [smem:[#allocation20_spill]] (!%p786_p2) }
 0x1e8   : > { %470 = sbr.rel (%p786_p2) target bundleno = 1080 (0x438), region = 72 }
 0x1ed   : > { %v472_v18 = vlaneseq  ;;  %v471_v19 = vld [vmem:[%s342_s18] sm:$0xff]  ;;  %v1191_v22 = vmov 0   ;;  %v476_v23 = vld [vmem:[#allocation2] sm:$0xff]  ;;  %vm496_vm3 = vcmask 7168   ;;  %s787_s19 = sshll.u32 %s1591_s20, 3  ;;  %v1192_v35 = vmov 0.0  }
 0x1ee   : > { %925 = vset.pattern.permute.xlu0 %v1191_v22  ;;  %v535_v32 = vstv %s787_s19  ;;  %v506_v34 = vld [vmem:[%s372_s8] sm:$0xff]  ;;  %v522_v56 = vld [vmem:[%s362_s13] sm:$0xff]  ;;  %vm565_vm9 = vcmask 261120  }
 0x1ef   : > { %v473_v20 = vand.u32 127, %v472_v18  ;;  %v533_v31 = vshrl.u32 %v472_v18, 7  ;;  %vm512_vm5 = vweird.f32 %v506_v34  ;;  %v518_v43 = vand.u32 2147483648, %v506_v34  ;;  %v483_v45 = vld [vmem:[#allocation3] sm:$0xff]  ;;  %v521_v55 = vld [vmem:[%s1451_s6] sm:$0xff] }
 0x1f0   : > { %v516_v47 = vand.u32 2147483647, %v506_v34  ;;  %v524_v54 = vld [vmem:[%s352_s24] sm:$0xff]  ;;  %v523_v58 = vsub.f32 %v521_v55, %v522_v56 }
 0x1f1   : > { %vm474_vm2 = vcmp.lt.s32.totalorder %v473_v20, 44  ;;  %v536_v33 = vadd.s32 %v535_v32, %v533_v31  ;;  %v519_v49 = vor.u32 1.1754944e-38, %v518_v43  ;;  %v504_v2 = vld [vmem:[%s1446_s27] sm:$0xff] }
 0x1f2   : > { %v475_v21 = vsel %vm474_vm2, %v471_v19, -inf  ;;  %vm517_vm8 = vcmp.eq.f32.partialorder %v516_v47, 8.507059e+37  ;;  %v525_v60 = vmul.f32 %v523_v58, %v523_v58 }
 0x1f3   : > { %477 = vmax.xlane.f32.xlu0 %v475_v21  ;;  %vm537_vm4 = vcmp.lt.s32.totalorder %v536_v33, 12 }
 0x1f4   : > { %v788_v36 = vsel %vm537_vm4, 1.0, %v1192_v35  ;;  %v526_v62 = vadd.f32 %v525_v60, %v524_v54 }
 0x1f5   : > { %v543_v37 = vsel %vm496_vm3, %v788_v36, 0.0 }
 0x266   : > { %v478_v24 = vpop.xlane.xlu0 %477 }
 0x267   : > { %v479_v25 = vmax.f32 %v476_v23, %v478_v24 }
 0x269   : > { %v480_v26 = vsub.f32 %v476_v23, %v479_v25  ;;  %487 = vperm.xlu0 %925, %v479_v25   ;;  %498 = vst.msk [vmem:[#allocation2] sm:$0xff] %vm496_vm3, %v479_v25 }
 0x26b   : > { %v481_v40 = vmul.f32 1.442695, %v480_v26 }
 0x270   : > { %v499_v1 = vld [vmem:[#allocation2] sm:$0xff] }
 0x2db   : > { %v488_v27 = vpop.permute.xlu0 %487 }
 0x2dc   : > { %v490_v28 = vsub.f32 %v475_v21, %v488_v27 }
 0x2de   : > { %v491_v29 = vmul.f32 1.442695, %v490_v28 }
 0x2e0   : > { %926 = vpow2.f32 %v491_v29 }
 0x2e1   : > { %928 = vrcp.f32 %v506_v34 }
 0x2e2   : > { %930 = vpow2.f32 %v481_v40 }
 0x2e6   : > { %v927_v30 = vpop.eup %926 }
 0x2e7   : > { %493 = vadd.xlane.f32.xlu1 %v927_v30  ;;  %v929_v38 = vpop.eup %928 }
 0x2e8   : > { %v508_v39 = vmul.f32 %v929_v38, %v506_v34  ;;  %vm513_vm6 = vweird.f32 %v929_v38  ;;  %v931_v44 = vpop.eup %930 }
 0x2e9   : > { %vm514_vm7 = vmor %vm512_vm5, %vm513_vm6  ;;  %v484_v48 = vmul.f32 %v931_v44, %v483_v45 }
 0x2ea   : > { %v509_v41 = vsub.f32 1.0, %v508_v39 }
 0x2ec   : > { %v510_v42 = vmul.f32 %v929_v38, %v509_v41 }
 0x2ee   : > { %v511_v46 = vadd.f32 %v929_v38, %v510_v42 }
 0x2ef   : > { %544 = vadd.xlane.f32.xlu1 %v543_v37 }
 0x2f0   : > { %v515_v51 = vsel %vm514_vm7, %v929_v38, %v511_v46 }
 0x2f1   : > { %v520_v53 = vsel %vm517_vm8, %v519_v49, %v515_v51 }
 0x2f2   : > { %v528_v57 = vmul.f32 %v524_v54, %v520_v53  ;;  %v527_v4 = vmul.f32 %v526_v62, %v520_v53 }
 0x2f4   : > { %932 = vlog2.f32 %v528_v57 }
 0x2fa   : > { %v933_v61 = vpop.eup %932 }
 0x2fb   : > { %v530_v5 = vmul.f32 0.6931472, %v933_v61 }
 0x2fd   : > { %v531_v8 = vsub.f32 %v527_v4, %v530_v5 }
 0x2ff   : > { %v541_v10 = vsel %vm537_vm4, %v531_v8, 0.0 }
 0x300   : > { %v566_v11 = vsel %vm565_vm9, %v541_v10, 0.0 }
 0x35a   : > { %v494_v50 = vpop.xlane.xlu1 %493 }
 0x35b   : > { %v495_v52 = vadd.f32 %v494_v50, %v484_v48 }
 0x35d   : > { %497 = vst.msk [vmem:[#allocation3] sm:$0xff] %vm496_vm3, %v495_v52 }
 0x362   : > { %v545_v12 = vpop.xlane.xlu1 %544 }
 0x363   : > { %v546_v13 = vrot.slane %v545_v12, 4 }
 0x364   : > { %v500_v59 = vld [vmem:[#allocation3] sm:$0xff] }
 0x365   : > { %934 = vlog2.f32 %v500_v59  ;;  %v547_v14 = vadd.f32 %v546_v13, %v545_v12 }
 0x367   : > { %v548_v15 = vrot.slane %v547_v14, 2 }
 0x369   : > { %v549_v16 = vadd.f32 %v548_v15, %v547_v14 }
 0x36b   : > { %v935_v63 = vpop.eup %934  ;;  %v550_v17 = vrot.slane %v549_v16, 1 }
 0x36c   : > { %v502_v0 = vmul.f32 0.6931472, %v935_v63 }
 0x36d   : > { %v551_v18 = vadd.f32 %v550_v17, %v549_v16 }
 0x36e   : > { %v503_v3 = vadd.f32 %v502_v0, %v499_v1 }
 0x36f   : > { %792 = vpush %v551_v18 }
 0x370   : > { %v505_v6 = vsub.f32 %v503_v3, %v504_v2 }
 0x372   : > { %v538_v7 = vsel %vm537_vm4, %v505_v6, 0.0 }
 0x373   : > { %v554_v9 = vsel %vm496_vm3, %v538_v7, 0.0 }
 0x374   : > { %555 = vadd.xlane.f32.xlu2 %v554_v9 }
 0x37c   : > { %567 = vadd.xlane.f32.xlu2 %v566_v11 }
 0x3a0   : > { %s793_s18 = spop %792 }
 0x3a1   : > { %v553_v33 = vstv %s793_s18 }
 0x3a2   : > { %v577_v34 = vmul.f32 32.0, %v553_v33 }
 0x3e7   : > { %v556_v19 = vpop.xlane.xlu2 %555 }
 0x3e8   : > { %v557_v20 = vrot.slane %v556_v19, 4 }
 0x3ea   : > { %v558_v21 = vadd.f32 %v557_v20, %v556_v19 }
 0x3ec   : > { %v559_v22 = vrot.slane %v558_v21, 2 }
 0x3ee   : > { %v560_v23 = vadd.f32 %v559_v22, %v558_v21 }
 0x3ef   : > { %v568_v24 = vpop.xlane.xlu2 %567 }
 0x3f0   : > { %v569_v25 = vrot.slane %v568_v24, 4  ;;  %v561_v26 = vrot.slane %v560_v23, 1 }
 0x3f2   : > { %v570_v27 = vadd.f32 %v569_v25, %v568_v24  ;;  %v562_v28 = vadd.f32 %v561_v26, %v560_v23 }
 0x3f4   : > { %v571_v29 = vrot.slane %v570_v27, 2  ;;  %794 = vpush %v562_v28 }
 0x3f6   : > { %v572_v30 = vadd.f32 %v571_v29, %v570_v27 }
 0x3f8   : > { %v573_v31 = vrot.slane %v572_v30, 1 }
 0x3fa   : > { %v574_v32 = vadd.f32 %v573_v31, %v572_v30 }
 0x3fc   : > { %796 = vpush %v574_v32 }
 0x425   : > { %s795_s11 = spop %794 }
 0x426   : > { %v564_v39 = vstv %s795_s11 }
 0x42d   : > { %s797_s24 = spop %796 }
 0x42e   : > { %v576_v35 = vstv %s797_s24 }
 0x42f   : > { %v578_v36 = vsub.f32 %v576_v35, %v577_v34 }
 0x431   : > { %v579_v37 = vmul.f32 0.5, %v578_v36 }
 0x433   : > { %v580_v38 = vmul.f32 0.002, %v579_v37 }
 0x435   : > { %v581_v40 = vadd.f32 %v580_v38, %v564_v39 }
 0x437   : > { %582 = vst [vmem:[%s423_s12] sm:$0x1] %v581_v40 }
 0x438 PF: > { %s1592_s13 = sld [smem:[#allocation20_spill]]  ;;  %s594_s27 = sshll.u32 %s423_s12, 4  ;;  %s595_s27 = int_to_ptr.vmem [resolvable:$true] %s594_s27 }
 0x439   : > { %s1593_s14 = sld [smem:[#allocation31_spill]]  ;;  %s584_s3 = scalar_lea.sflag [#allocation6], %s1424_s28 }
 0x43f   : > { %s592_s22 = scalar_lea.hbm %s1593_s14, %s1592_s13  ;;  %s1076_s30 = scalar_lea.hbm %s1593_s14, 2 }
 0x440   : > { %s596_s9 = sshll.u32 %s592_s22, 4  ;;  %s597_s9 = int_to_ptr.hbm [resolvable:$true] %s596_s9 }
 0x441   : > { %s1070_s17 = sshra.s32 %s597_s9, 4  ;;  %s1071_s17 = int_to_ptr.hbm [resolvable:$true] %s1070_s17 }
 0x442   : > { %s1072_s6 = scalar_lea.hbm %s1071_s17, 1  ;;  %p1077_p12 = scmp.lt.s32.totalorder %s1071_s17, %s1593_s14 }
 0x443   : > { %p1073_p4 = scmp.ne.s32.totalorder %s1071_s17, %s1072_s6  ;;  %p1078_p13 = scmp.lt.s32.totalorder %s1076_s30, %s1072_s6 }
 0x445   : > { %p1074_p5 = pnand %p1073_p4, %p1307_p8  ;;  %p1079_p0 = por %p1078_p13, %p1077_p12 }
 0x447   : > { %p1075_p6 = pneg %p1074_p5 }
 0x449   : > { %p1080_p3 = pnand %p1079_p0, %p1075_p6 }
 0x44b   : > { %1083 = shalt.err (!%p1080_p3)
}
 0x44c   : > { %806 = dma.vmem_to_hbm [thread:$0]  (%p1307_p8), %s595_s27, 16, %s597_s9, %s584_s3  }
 0x44d PF: > { %s1595_s28 = sld [smem:[#allocation17_spill]]  ;;  %p826_p1 = scmp.ge.s32.totalorder %s1186_s7, 2 }
 0x44f   : > { %p822_p10 = pnand %p826_p1, %p1311_p9 }
 0x451   : > { %p823_p11 = pneg %p822_p10 }
 0x453   : > { %s608_s18 = sand.u32 1, %s1595_s28  }
 0x454   : > { %s609_s11 = scalar_lea.sflag [#allocation6], %s608_s18 }
 0x455   : > { %1141 = dma.done.wait (%p823_p11), %s609_s11, 16  }
 0x456   : > { %1143 = vsyncadd (%p823_p11), %s609_s11, 4294967280  ;;  %s28_s7 = sadd.s32 1, %s1186_s7   ;;  %s1597_s21 = sld [smem:[#allocation18_spill]] }
 0x457   : > { %p25_p7 = scmp.ge.s32.totalorder %s28_s7, 8   ;;  %s1598_s28 = sld [smem:[#allocation21_spill]] }
 0x458   : > { %s1599_s13 = sld [smem:[#allocation26_spill]]  ;;  %s1601_s22 = smov %s1154_s23 }
 0x459   : > { %s1600_s30 = sld [smem:[#allocation27_spill]]  ;;  %s1602_s23 = smov %s1382_s2 }
 0x45a   : > { %s1603_s24 = smov %s1162_s25  ;;  %s1604_s25 = smov %s1166_s26 }
 0x45b   : > { %s1605_s26 = smov %s1385_s1  ;;  %s1606_s27 = smov %s1178_s29 }
 0x45c   :  { %27 = sbr.rel (!%p25_p7) target bundleno = 18 (0x12), region = 144 }
 0x45e   : > { %s1607_s29 = smov %s1599_s13 }
 0x461   :  { %614 = vsyncpa [#allocation5], 1 }
 0x462   :  { %616 = vsyncpa [#allocation5 + $0x1], 1 }
 0x463   :  { %617 = vsyncpa [#allocation8], 1 }
 0x464   :  { %619 = vsyncpa [#allocation8 + $0x1], 1 }
 0x465   :  { %620 = vsyncpa [#allocation11], 1 }
 0x466   :  { %622 = vsyncpa [#allocation11 + $0x1], 1 }
 0x467   :  { %623 = vsyncpa [#allocation6], 1 }
 0x468   :  { %625 = vsyncpa [#allocation6 + $0x1], 1 }

</bundles_post_ra>
